<compile_context>
chip_gen: v6e
topology: v6e:2x2x1
jax: 0.10.0
libtpu: 0.0.40
codegen_flags: <defaults>
</compile_context>

<pallas_src>
import jax
import jax.numpy as jnp
from jax import lax
from jax.experimental import pallas as pl
from jax.experimental.pallas import tpu as pltpu

# torch.nn.functional.normalize clamps the norm at eps=1e-12; we clamp the
# *squared* norm:  x * rsqrt(max(||x||^2, eps^2)) == x / max(||x||, eps).
# Plain Python float only (jnp scalars would be captured kernel constants).
_EPS_SQ = 1e-24


def _agent_center_loss_kernel(x_ref, cnt_ref, lab_ref, acc_ref):
    """Accumulates per-row sum(one_hot * cos_raw) into the resident output block.

    x_ref:   (TILE_B, D)  input dtype  streamed batch tile
    cnt_ref: (D, C)       f32          pre-normalized, pre-transposed centers (resident)
    lab_ref: (TILE_B, 1)  i32          labels for this tile (-1 => padding row)
    acc_ref: (TILE_B, 1)  f32          resident output block: per-row partial sums
    """
    i = pl.program_id(1)  # inner ("arbitrary") accumulation axis

    @pl.when(i == 0)
    def _init():
        acc_ref[...] = jnp.zeros_like(acc_ref)

    x = x_ref[...].astype(jnp.float32)
    x_sumsq = jnp.sum(x * x, axis=-1, keepdims=True)
    xn = x * lax.rsqrt(jnp.maximum(x_sumsq, _EPS_SQ))  # EUP rsqrt, no VPU divides

    # (TILE_B, C) = (TILE_B, D) @ (D, C): canonical MXU contraction; centers
    # were transposed once in the wrapper so no per-step relayout is emitted.
    cos_raw = jnp.dot(xn, cnt_ref[...], preferred_element_type=jnp.float32)

    class_ids = lax.broadcasted_iota(jnp.int32, cos_raw.shape, 1)
    hit = class_ids == lab_ref[...]          # one-hot mask; label -1 never matches
    masked = jnp.where(hit, cos_raw, 0.0)    # select => garbage/NaN rows cannot leak

    # One lane reduce + VPU add into the resident accumulator block.
    acc_ref[...] += jnp.sum(masked, axis=-1, keepdims=True)


def _pick_tile_b(B, D, C, x_itemsize, vmem_budget_bytes):
    """Batch tile sized against a conservative VMEM budget (multiple of 8)."""
    centers_bytes = 2 * D * C * 4            # (D, C) f32 block, default double buffer
    per_row = 2 * D * x_itemsize             # x double buffer
    per_row += 4 * D                         # xn f32 temp
    per_row += 3 * 4 * C                     # cos_raw + iota + masked temps
    per_row += 2 * 4 + 2 * 4                 # labels (i32) + output acc (f32) buffers
    avail = max(vmem_budget_bytes - centers_bytes, 8 * per_row)
    tile_b = (avail // per_row // 8) * 8
    tile_b = max(8, min(2048, tile_b))
    tile_b = min(tile_b, ((B + 7) // 8) * 8)  # never bigger than the 8-rounded batch
    return tile_b


def agent_center_loss(x, centers, labels, scale, *, tile_b=None, num_chunks=None,
                      vmem_budget_bytes=24 * 1024 * 1024,
                      vmem_limit_bytes=40 * 1024 * 1024):
    """x: (B, D), centers: (C, D), labels: (B,) int in [0, C).  Returns the
    scalar AgentCenterLoss (mean over B*C), matching the PyTorch forward."""
    B, D = x.shape
    C, Dc = centers.shape
    assert D == Dc, "feature dim mismatch"
    # Like torch's scatter_, every label must lie in [0, C): the simplification
    # below uses sum(one_hot) == B.

    # One-time O(C*D) prep in plain XLA: normalize + transpose centers so the
    # kernel keeps a single resident (D, C) f32 block (no scratch copy).
    c32 = centers.astype(jnp.float32)
    c_sumsq = jnp.sum(c32 * c32, axis=-1, keepdims=True)
    cnt = (c32 * lax.rsqrt(jnp.maximum(c_sumsq, _EPS_SQ))).T  # (D, C)

    labels_2d = labels.reshape(B, 1).astype(jnp.int32)

    if tile_b is None:
        tile_b = _pick_tile_b(B, D, C, jnp.dtype(x.dtype).itemsize, vmem_budget_bytes)
    num_tiles = -(-B // tile_b)

    # Leading "parallel" axis: up to one chunk per TensorCore (2 on v7x);
    # harmless no-op on single-core v5e/v6e.
    if num_chunks is None:
        num_chunks = 2 if num_tiles >= 2 else 1
    tpc = -(-num_tiles // num_chunks)  # tiles per chunk

    # Only labels are padded (tiny).  x is NOT padded: ragged / duplicated
    # tiles are neutralized by the label == -1 select inside the kernel.
    b_pad = num_chunks * tpc * tile_b
    if b_pad > B:
        labels_2d = jnp.pad(labels_2d, ((0, b_pad - B), (0, 0)), constant_values=-1)

    last_tile = num_tiles - 1

    partials = pl.pallas_call(
        _agent_center_loss_kernel,
        out_shape=jax.ShapeDtypeStruct((num_chunks * tile_b, 1), jnp.float32),
        grid_spec=pltpu.PrefetchScalarGridSpec(
            num_scalar_prefetch=0,
            grid=(num_chunks, tpc),
            in_specs=[
                # x tiles; the clamp keeps the block in-bounds when num_tiles is
                # not a multiple of num_chunks (extra steps re-read the last
                # tile but see only -1 labels, so they contribute exactly 0).
                pl.BlockSpec(
                    (tile_b, D),
                    lambda c, i: (jnp.minimum(c * tpc + i, last_tile), 0),
                ),
                pl.BlockSpec((D, C), lambda c, i: (0, 0)),                 # centers: resident
                pl.BlockSpec((tile_b, 1), lambda c, i: (c * tpc + i, 0)),  # labels: streamed
            ],
            out_specs=pl.BlockSpec((tile_b, 1), lambda c, i: (c, 0)),      # per-chunk accumulator
        ),
        compiler_params=pltpu.CompilerParams(
            dimension_semantics=("parallel", "arbitrary"),
            vmem_limit_bytes=vmem_limit_bytes,
        ),
    )(x, cnt, labels_2d)

    masked_sum = jnp.sum(partials)
    # loss = mean(one_hot*scale - one_hot*(cos_raw*scale))
    #      = scale * (B - sum(one_hot * cos_raw)) / (B * C)
    return jnp.float32(scale) * (jnp.float32(B) - masked_sum) / jnp.float32(B * C)


if __name__ == "__main__":
    num_classes = 16
    feat_dim = 32
    batch = 8
    scale = 10.0

    key = jax.random.PRNGKey(0)
    k_centers, k_x, k_lab = jax.random.split(key, 3)

    # nn.Parameter(torch.randn(num_classes, feat_dim)) -> deterministic normal init
    centers = jax.random.normal(k_centers, (num_classes, feat_dim), dtype=jnp.float32)
    x = jax.random.normal(k_x, (batch, feat_dim), dtype=jnp.float32)
    labels = jax.random.randint(k_lab, (batch,), 0, num_classes, dtype=jnp.int32)

    loss = agent_center_loss(x, centers, labels, scale)
    jax.block_until_ready(loss)

    # Pure-JAX reference (mirrors the PyTorch module's forward).
    xn = x / jnp.maximum(jnp.linalg.norm(x, axis=-1, keepdims=True), 1e-12)
    cn = centers / jnp.maximum(jnp.linalg.norm(centers, axis=-1, keepdims=True), 1e-12)
    cos_dis = xn @ cn.T * scale
    one_hot = jax.nn.one_hot(labels, num_classes, dtype=jnp.float32)
    ref = jnp.mean(one_hot * scale - one_hot * cos_dis)

    assert jnp.allclose(loss, ref, atol=1e-5, rtol=1e-5), (loss, ref)
    print("KERNEL_OK")
</pallas_src>

<mosaic_0001>
module attributes {stable_mosaic.version = 11 : i64} {
  func.func @_agent_center_loss_kernel(%arg0: i32, %arg1: i32, %arg2: memref<8x32xf32, #tpu.memory_space<vmem>>, %arg3: memref<32x16xf32, #tpu.memory_space<vmem>>, %arg4: memref<8x1xi32, #tpu.memory_space<vmem>>, %arg5: memref<8x1xf32, #tpu.memory_space<vmem>>) attributes {dimension_semantics = [#tpu.dimension_semantics<parallel>, #tpu.dimension_semantics<arbitrary>], iteration_bounds = array<i64: 1, 1>, scalar_prefetch = 0 : i64, scratch_operands = 0 : i64, tpu.core_type = #tpu.core_type<tc>, window_params = [{transform_indices = @transform_0, window_bounds = array<i64: 8, 32>}, {pipeline_mode = #tpu.pipeline_mode<synchronous>, transform_indices = @transform_1, window_bounds = array<i64: 32, 16>}, {transform_indices = @transform_2, window_bounds = array<i64: 8, 1>}, {transform_indices = @transform_3, window_bounds = array<i64: 8, 1>}]} {
    %c0_i32 = arith.constant 0 : i32
    %0 = arith.cmpi eq, %arg1, %c0_i32 : i32
    %1 = arith.extui %0 : i1 to i32
    %c0_i32_0 = arith.constant 0 : i32
    %2 = arith.cmpi ne, %1, %c0_i32_0 : i32
    scf.if %2 {
      %cst_14 = arith.constant 0.000000e+00 : f32
      %25 = vector.broadcast %cst_14 : f32 to vector<8x1xf32>
      %c0_15 = arith.constant 0 : index
      %c0_16 = arith.constant 0 : index
      %26 = vector.load %arg5[%c0_15, %c0_16] : memref<8x1xf32, #tpu.memory_space<vmem>>, vector<8x1xf32>
      tpu.vector_store %arg5[%c0_15, %c0_16], %25 {strides = array<i32>} : memref<8x1xf32, #tpu.memory_space<vmem>>, vector<8x1xf32>,
    } else {
    }
    %c0 = arith.constant 0 : index
    %c0_1 = arith.constant 0 : index
    %3 = vector.load %arg2[%c0, %c0_1] : memref<8x32xf32, #tpu.memory_space<vmem>>, vector<8x32xf32>
    %4 = arith.mulf %3, %3 : vector<8x32xf32>
    %cst = arith.constant dense<0.000000e+00> : vector<8xf32>
    %5 = vector.multi_reduction <add>, %4, %cst [1] : vector<8x32xf32> to vector<8xf32>
    %6 = vector.shape_cast %5 : vector<8xf32> to vector<8x1xf32>
    %cst_2 = arith.constant 1.000000e-24 : f32
    %7 = vector.broadcast %cst_2 : f32 to vector<8x1xf32>
    %8 = arith.maximumf %6, %7 : vector<8x1xf32>
    %9 = math.rsqrt %8 : vector<8x1xf32>
    %10 = vector.broadcast %9 : vector<8x1xf32> to vector<8x32xf32>
    %11 = arith.mulf %3, %10 : vector<8x32xf32>
    %c0_3 = arith.constant 0 : index
    %c0_4 = arith.constant 0 : index
    %12 = vector.load %arg3[%c0_3, %c0_4] : memref<32x16xf32, #tpu.memory_space<vmem>>, vector<32x16xf32>
    %cst_5 = arith.constant dense<0.000000e+00> : vector<8x16xf32>
    %13 = tpu.matmul %11, %12, %cst_5 {dimension_numbers = #tpu.dot_dimension_numbers<[1], [0], [0], [1], [0, 0, 1, 1], [], []>} : vector<8x32xf32>, vector<32x16xf32>, vector<8x16xf32> -> vector<8x16xf32>
    %14 = tpu.iota {dimensions = array<i32: 1>} : vector<8x16xi32>
    %c0_6 = arith.constant 0 : index
    %c0_7 = arith.constant 0 : index
    %15 = vector.load %arg4[%c0_6, %c0_7] : memref<8x1xi32, #tpu.memory_space<vmem>>, vector<8x1xi32>
    %16 = vector.broadcast %15 : vector<8x1xi32> to vector<8x16xi32>
    %17 = arith.cmpi eq, %14, %16 : vector<8x16xi32>
    %cst_8 = arith.constant 0.000000e+00 : f32
    %18 = vector.broadcast %cst_8 : f32 to vector<8x16xf32>
    %19 = arith.select %17, %13, %18 : vector<8x16xi1>, vector<8x16xf32>
    %c0_9 = arith.constant 0 : index
    %c0_10 = arith.constant 0 : index
    %20 = vector.load %arg5[%c0_9, %c0_10] : memref<8x1xf32, #tpu.memory_space<vmem>>, vector<8x1xf32>
    %cst_11 = arith.constant dense<0.000000e+00> : vector<8xf32>
    %21 = vector.multi_reduction <add>, %19, %cst_11 [1] : vector<8x16xf32> to vector<8xf32>
    %22 = vector.shape_cast %21 : vector<8xf32> to vector<8x1xf32>
    %23 = arith.addf %20, %22 : vector<8x1xf32>
    %c0_12 = arith.constant 0 : index
    %c0_13 = arith.constant 0 : index
    %24 = vector.load %arg5[%c0_12, %c0_13] : memref<8x1xf32, #tpu.memory_space<vmem>>, vector<8x1xf32>
    tpu.vector_store %arg5[%c0_12, %c0_13], %23 {strides = array<i32>} : memref<8x1xf32, #tpu.memory_space<vmem>>, vector<8x1xf32>,
    return
  }
  func.func @transform_0(%arg0: i32, %arg1: i32) -> (i32, i32) {
    %c1_i32 = arith.constant 1 : i32
    %0 = arith.muli %arg0, %c1_i32 : i32
    %1 = arith.addi %0, %arg1 : i32
    %c0_i32 = arith.constant 0 : i32
    %2 = arith.minsi %1, %c0_i32 : i32
    %c0_i32_0 = arith.constant 0 : i32
    %c0_i32_1 = arith.constant 0 : i32
    return %2, %c0_i32_0 : i32, i32
  }
  func.func @transform_1(%arg0: i32, %arg1: i32) -> (i32, i32) {
    %c0_i32 = arith.constant 0 : i32
    %c0_i32_0 = arith.constant 0 : i32
    %c0_i32_1 = arith.constant 0 : i32
    return %c0_i32, %c0_i32_0 : i32, i32
  }
  func.func @transform_2(%arg0: i32, %arg1: i32) -> (i32, i32) {
    %c1_i32 = arith.constant 1 : i32
    %0 = arith.muli %arg0, %c1_i32 : i32
    %1 = arith.addi %0, %arg1 : i32
    %c0_i32 = arith.constant 0 : i32
    %c0_i32_0 = arith.constant 0 : i32
    return %1, %c0_i32 : i32, i32
  }
  func.func @transform_3(%arg0: i32, %arg1: i32) -> (i32, i32) {
    %c0_i32 = arith.constant 0 : i32
    %c0_i32_0 = arith.constant 0 : i32
    return %arg0, %c0_i32 : i32, i32
  }
}

</mosaic_0001>

<bundles_post_ra>
// kernel: tpu_custom_call.1
= control target key start
LH: loop header
LB: loop body
LE: loop exit
PB: predicated region body
PF: predicated region fallthrough
CT: control target
= control target key end

     0   :  { %vm66_vm0 = vcmask 261120   ;;  %v205_v3 = vmov 0.0   ;;  %vm206_vm1 = vmmov 0   ;;  %v207_v8 = vmov 0   ;;  %s257_s0 = inlined_call_operand.vmem [shape: f32[8,32], index: 0, kind: input, shape index: {}]   ;;  %s258_s1 = inlined_call_operand.vmem [shape: f32[32,16], index: 1, kind: input, shape index: {}]   ;;  %s259_s2 = inlined_call_operand.vmem [shape: s32[8,1], index: 2, kind: input, shape index: {}]   ;;  %s260_s3 = inlined_call_operand.vmem [shape: f32[8,1], index: 3, kind: output, shape index: {}]  }
   0x1   :  { %v64_v0 = vld [vmem:[%s257_s0] sm:$0xff]  ;;  %188 = vmatprep.subr.mxu0 %v205_v3  ;;  %v76_v4 = vld [vmem:[%s258_s1 + $0x18] sm:$0xff]  ;;  %v75_v5 = vld [vmem:[%s258_s1 + $0x10] sm:$0xff]  ;;  %196 = vmatprep.mubr.msk.f32.mxu0 %vm206_vm1, %v205_v3  ;;  %vm62_vm2 = vcmask 7168   ;;  %v150_v14 = vlaneseq  ;;  %vm159_vm4 = vcmask 130048  }
   0x2   :  { %v65_v1 = vmul.f32 %v64_v0, %v64_v0  ;;  %189 = vmatpush3.msra.mxu0 %v76_v4  ;;  %v74_v6 = vld [vmem:[%s258_s1 + $0x8] sm:$0xff]  ;;  %v73_v7 = vld [vmem:[%s258_s1] sm:$0xff]  ;;  %202 = vset.pattern.permute.xlu0 %v207_v8  ;;  %63 = vst.msk [vmem:[%s260_s3] sm:$0xff] %vm62_vm2, %v205_v3 }
   0x3   :  { %190 = vmatprep.subr.mxu0 %v205_v3  ;;  %v152_v9 = vld [vmem:[%s259_s2] sm:$0xff]  ;;  %v151_v15 = vand.u32 127, %v150_v14 }
   0x4   :  { %v67_v2 = vsel %vm66_vm0, %v65_v1, 0.0  ;;  %191 = vmatpush3.msra.mxu0 %v75_v5 }
   0x5   :  { %68 = vadd.xlane.f32.xlu0 %v67_v2  ;;  %192 = vmatprep.subr.mxu0 %v205_v3 }
   0x6   :  { %193 = vmatpush3.msra.mxu0 %v74_v6 }
   0x7   :  { %194 = vmatprep.subr.mxu0 %v205_v3 }
   0x8   :  { %195 = vmatpush3.msra.mxu0 %v73_v7 }
   0x9   :  { %v158_v21 = vld [vmem:[%s260_s3] sm:$0xff] }
  0x1b   :  { %154 = vperm.xlu0 %202, %v152_v9  }
  0x8e   :  { %v69_v10 = vpop.xlane.xlu0 %68 }
  0x8f   :  { %v70_v11 = vmax.f32 %v69_v10, 1e-24 }
  0x91   :  { %203 = vrsqrt.f32 %v70_v11 }
  0x96   :  { %v155_v16 = vpop.permute.xlu0 %154 }
  0x97   :  { %vm156_vm3 = vcmp.eq.s32.totalorder %v151_v15, %v155_v16 }
  0x9e   :  { %v204_v12 = vpop.eup %203 }
  0x9f   :  { %v72_v13 = vmul.f32 %v204_v12, %v64_v0 }
  0xa1   :  { %197 = vmatmul.mubr.msk.f32.vlgmr.msra.gmra.mxu0 %vm66_vm0, %v72_v13 }
 0x161   :  { %v146_v17 = vpop.f32.mrf.mxu0 }
 0x162   :  { %v157_v18 = vsel %vm156_vm3, %v146_v17, 0.0 }
 0x163   :  { %v198_v19 = vpop.f32.mrf.mxu0  ;;  %v160_v20 = vsel %vm159_vm4, %v157_v18, 0.0 }
 0x164   :  { %161 = vadd.xlane.f32.xlu1 %v160_v20 }
 0x1ed   :  { %v162_v22 = vpop.xlane.xlu1 %161 }
 0x1ee   :  { %v163_v23 = vadd.f32 %v162_v22, %v158_v21 }
 0x1f0   :  { %165 = vst.msk [vmem:[%s260_s3] sm:$0xff] %vm62_vm2, %v163_v23 }

</bundles_post_ra>
